<compile_context>
chip_gen: v6e
topology: v6e:2x2x1
jax: 0.10.0
libtpu: 0.0.40
codegen_flags: <defaults>
</compile_context>

<pallas_src>
import jax
import jax.numpy as jnp
from jax.experimental import pallas as pl
from jax.experimental.pallas import tpu as pltpu

LAYER_DIMS = [1, 20, 50, 100, 50, 20, 1]   # from nn.Sequential in __init__
HID = 128                                   # padded hidden width (MXU lane dim)
R1 = 32                                     # layer-1 output rows, rounded to 16
MID_ROWS = (64, 112, 64, 32)                # layers 2..5 output rows, rounded to 16
TN_MAX = 2048                               # max batch tile (lanes); 2-4K amortizes
LANE = 128                                  # the ~0.35us/step grid overhead


def _cdiv(a, b):
    return -(-a // b)


def _round_up(a, m):
    return _cdiv(a, m) * m


def mlp_kernel(x_ref, l1_ref, w_mid_ref, b_mid_ref, w6_ref, b6_ref, out_ref, h_ref):
    """One lane-dense batch tile of the 6-layer MLP (activations are [hidden, TN]).

    x_ref    : [1, 1, TN]     f32   batch tile, batch on lanes
    l1_ref   : [2, 32, 1]     f32   row 0 = 0.5*W1^T column, row 1 = 0.5*b1 column
    w_mid_ref: [4, 128, 128]  bf16  0.25*W_i^T, zero padded (VMEM resident)
    b_mid_ref: [4, 128, 1]    f32   folded biases 0.5*b_i + 0.25*sum_rows(W_i)
    w6_ref   : [32, 1]        f32   0.5*W6 column, zero padded
    b6_ref   : [1, 1]         f32   folded head bias (SMEM scalar)
    out_ref  : [1, 1, TN]     f32   lane-dense output row
    h_ref    : [128, TN]      bf16  scratch activation buffer
    """
    tn = x_ref.shape[-1]
    x = x_ref[0]                                               # [1, TN] f32

    # Layer 1 (1 -> 20): contraction dim is 1 -> pure VPU broadcast FMA.
    # Affine-folded sigmoid => bare tanh (padded rows give tanh(0) = 0).
    t = jnp.tanh(l1_ref[0] * x + l1_ref[1])                    # [32, TN] f32
    h_ref[0:R1, :] = t.astype(jnp.bfloat16)
    # Zero the remaining sublanes once per tile so every matmul below reads a
    # fully-defined buffer (the zero weight columns then annihilate these rows).
    h_ref[R1:HID, :] = jnp.zeros((HID - R1, tn), jnp.bfloat16)

    # Layers 2-5 (20->50->100->50->20): bf16 MXU matmuls with f32 accumulate;
    # bias + tanh in f32 on the real (16-rounded) output sublanes only.
    for j, ro in enumerate(MID_ROWS):
        z = jnp.dot(w_mid_ref[j, :ro, :], h_ref[...],
                    preferred_element_type=jnp.float32)        # [ro, TN] f32
        t = jnp.tanh(z + b_mid_ref[j, :ro, :])                 # [ro, TN] f32
        if j < len(MID_ROWS) - 1:
            h_ref[0:ro, :] = t.astype(jnp.bfloat16)
        # Last hidden layer feeds the f32 head directly (no scratch round trip).

    # Layer 6 (20 -> 1): f32 multiply + cheap sublane reduce over 32 rows,
    # producing a lane-dense [1, TN] output row (unmasked stores).
    out_ref[0] = jnp.sum(w6_ref[...] * t, axis=0, keepdims=True) + b6_ref[0, 0]


def init_params(key):
    """Deterministic PyTorch-style init: U(-1/sqrt(fan_in), 1/sqrt(fan_in))."""
    params = []
    for i in range(len(LAYER_DIMS) - 1):
        fan_in, fan_out = LAYER_DIMS[i], LAYER_DIMS[i + 1]
        key, kw, kb = jax.random.split(key, 3)
        bound = fan_in ** -0.5
        w = jax.random.uniform(kw, (fan_in, fan_out), jnp.float32, -bound, bound)
        b = jax.random.uniform(kb, (fan_out,), jnp.float32, -bound, bound)
        params.append((w, b))
    return params


def pack_params(params):
    """One-time transpose / pad / bf16 cast / sigmoid-affine fold.

    With t_i = tanh(pre_i) and sigmoid(z) = 0.5*tanh(0.5*z)+0.5:
      pre_1 = 0.5*W1^T x + 0.5*b1
      pre_i = 0.25*W_i^T t_{i-1} + (0.5*b_i + 0.25*sum_rows(W_i))     i = 2..5
      y     = 0.5*W6^T t_5 + (b6 + 0.5*sum_rows(W6))
    All folds are done here in f32; the 0.5/0.25 weight scales are exact in bf16.
    """
    (w1, b1), mids, (w6, b6) = params[0], params[1:5], params[5]

    l1 = jnp.zeros((2, R1, 1), jnp.float32)
    l1 = l1.at[0, : w1.shape[1], 0].set(0.5 * w1[0])
    l1 = l1.at[1, : b1.shape[0], 0].set(0.5 * b1)

    w_mid = jnp.zeros((4, HID, HID), jnp.bfloat16)
    b_mid = jnp.zeros((4, HID, 1), jnp.float32)
    for j, (w, b) in enumerate(mids):
        fi, fo = w.shape
        w_mid = w_mid.at[j, :fo, :fi].set((0.25 * w.T).astype(jnp.bfloat16))
        b_mid = b_mid.at[j, :fo, 0].set(0.5 * b + 0.25 * jnp.sum(w, axis=0))

    w6c = jnp.zeros((R1, 1), jnp.float32).at[: w6.shape[0], 0].set(0.5 * w6[:, 0])
    b6s = jnp.reshape(b6 + 0.5 * jnp.sum(w6[:, 0]), (1, 1)).astype(jnp.float32)
    return (l1, w_mid, b_mid, w6c, b6s)


@jax.jit
def net_sigmoid6_slim(x, packed):
    """x: [N, 1] float32 -> [N, 1] float32."""
    l1, w_mid, b_mid, w6c, b6s = packed
    n = x.shape[0]

    # Tile selection: as large as possible (<= TN_MAX) while minimizing last-tile
    # padding; tn is a multiple of 128 so IO blocks are lane-dense.
    n_tiles = max(1, _cdiv(n, TN_MAX))
    tn = _round_up(_cdiv(max(n, 1), n_tiles), LANE)
    n_pad = n_tiles * tn
    if n_pad != n:
        x = jnp.pad(x, ((0, n_pad - n), (0, 0)))   # only when n is not tile-aligned
    x3 = x.reshape(n_tiles, 1, tn)                 # lane-dense batch rows

    out3 = pl.pallas_call(
        mlp_kernel,
        out_shape=jax.ShapeDtypeStruct((n_tiles, 1, tn), jnp.float32),
        grid=(n_tiles,),
        in_specs=[
            pl.BlockSpec((1, 1, tn), lambda i: (i, 0, 0)),       # x batch tile
            pl.BlockSpec((2, R1, 1), lambda i: (0, 0, 0)),       # 0.5*W1^T / 0.5*b1
            pl.BlockSpec((4, HID, HID), lambda i: (0, 0, 0)),    # 0.25*W2..5^T bf16
            pl.BlockSpec((4, HID, 1), lambda i: (0, 0, 0)),      # folded b2..5
            pl.BlockSpec((R1, 1), lambda i: (0, 0)),             # 0.5*W6 column
            pl.BlockSpec(memory_space=pltpu.MemorySpace.SMEM),   # folded b6 scalar
        ],
        out_specs=pl.BlockSpec((1, 1, tn), lambda i: (i, 0, 0)),
        scratch_shapes=[pltpu.VMEM((HID, tn), jnp.bfloat16)],
        compiler_params=pltpu.CompilerParams(
            dimension_semantics=("parallel",)),    # v7x: consider CORE_PARALLEL
    )(x3, l1, w_mid, b_mid, w6c, b6s)

    out = out3.reshape(n_pad, 1)
    return out if n_pad == n else out[:n]


def reference(x, params):
    h = x
    for i, (w, b) in enumerate(params):
        h = h @ w + b
        if i < len(params) - 1:
            h = jax.nn.sigmoid(h)
    return h


if __name__ == "__main__":
    key = jax.random.PRNGKey(0)
    params = init_params(key)
    packed = pack_params(params)

    key, k1, k2 = jax.random.split(key, 3)

    # Small batch (single 128-lane tile), matches the module's [N, 1] input.
    x_small = jax.random.normal(k1, (8, 1), jnp.float32)
    y_small = jax.block_until_ready(net_sigmoid6_slim(x_small, packed))
    y_small_ref = reference(x_small, params)
    assert y_small.shape == (8, 1)
    assert jnp.allclose(y_small, y_small_ref, rtol=2e-2, atol=2e-2), (
        y_small, y_small_ref)

    # Larger batch: exercises the multi-tile grid (2 tiles) and lane padding.
    x_big = jax.random.normal(k2, (2300, 1), jnp.float32)
    y_big = jax.block_until_ready(net_sigmoid6_slim(x_big, packed))
    y_big_ref = reference(x_big, params)
    assert y_big.shape == (2300, 1)
    assert jnp.allclose(y_big, y_big_ref, rtol=2e-2, atol=2e-2)

    print("KERNEL_OK")
</pallas_src>

<mosaic_0001>
module attributes {stable_mosaic.version = 11 : i64} {
  func.func @mlp_kernel(%arg0: i32, %arg1: memref<1x1x128xf32, #tpu.memory_space<vmem>>, %arg2: memref<2x32x1xf32, #tpu.memory_space<vmem>>, %arg3: memref<4x128x128xbf16, #tpu.memory_space<vmem>>, %arg4: memref<4x128x1xf32, #tpu.memory_space<vmem>>, %arg5: memref<32x1xf32, #tpu.memory_space<vmem>>, %arg6: memref<1x1xf32, #tpu.memory_space<smem>>, %arg7: memref<1x1x128xf32, #tpu.memory_space<vmem>>, %arg8: memref<128x128xbf16, #tpu.memory_space<vmem>>) attributes {dimension_semantics = [#tpu.dimension_semantics<parallel>], iteration_bounds = array<i64: 1>, scalar_prefetch = 0 : i64, scratch_operands = 1 : i64, tpu.core_type = #tpu.core_type<tc>, window_params = [{transform_indices = @transform_0, window_bounds = array<i64: 1, 1, 128>}, {pipeline_mode = #tpu.pipeline_mode<synchronous>, transform_indices = @transform_1, window_bounds = array<i64: 2, 32, 1>}, {pipeline_mode = #tpu.pipeline_mode<synchronous>, transform_indices = @transform_2, window_bounds = array<i64: 4, 128, 128>}, {pipeline_mode = #tpu.pipeline_mode<synchronous>, transform_indices = @transform_3, window_bounds = array<i64: 4, 128, 1>}, {pipeline_mode = #tpu.pipeline_mode<synchronous>, transform_indices = @transform_4, window_bounds = array<i64: 32, 1>}, {transform_indices = @transform_5, window_bounds = array<i64: 1, 1>}, {transform_indices = @transform_6, window_bounds = array<i64: 1, 1, 128>}]} {
    %c0 = arith.constant 0 : index
    %c0_0 = arith.constant 0 : index
    %c0_1 = arith.constant 0 : index
    %0 = vector.load %arg1[%c0, %c0_0, %c0_1] : memref<1x1x128xf32, #tpu.memory_space<vmem>>, vector<1x1x128xf32>
    %1 = vector.shape_cast %0 : vector<1x1x128xf32> to vector<1x128xf32>
    %c0_2 = arith.constant 0 : index
    %c0_3 = arith.constant 0 : index
    %c0_4 = arith.constant 0 : index
    %2 = vector.load %arg2[%c0_2, %c0_3, %c0_4] : memref<2x32x1xf32, #tpu.memory_space<vmem>>, vector<1x32x1xf32>
    %3 = vector.shape_cast %2 : vector<1x32x1xf32> to vector<32x1xf32>
    %4 = vector.broadcast %3 : vector<32x1xf32> to vector<32x128xf32>
    %5 = vector.broadcast %1 : vector<1x128xf32> to vector<32x128xf32>
    %6 = arith.mulf %4, %5 : vector<32x128xf32>
    %c1 = arith.constant 1 : index
    %c0_5 = arith.constant 0 : index
    %c0_6 = arith.constant 0 : index
    %7 = vector.load %arg2[%c1, %c0_5, %c0_6] : memref<2x32x1xf32, #tpu.memory_space<vmem>>, vector<1x32x1xf32>
    %8 = vector.shape_cast %7 : vector<1x32x1xf32> to vector<32x1xf32>
    %9 = vector.broadcast %8 : vector<32x1xf32> to vector<32x128xf32>
    %10 = arith.addf %6, %9 : vector<32x128xf32>
    %11 = math.tanh %10 : vector<32x128xf32>
    %12 = arith.truncf %11 : vector<32x128xf32> to vector<32x128xbf16>
    %c0_7 = arith.constant 0 : index
    %c0_8 = arith.constant 0 : index
    %13 = vector.load %arg8[%c0_7, %c0_8] : memref<128x128xbf16, #tpu.memory_space<vmem>>, vector<32x128xbf16>
    tpu.vector_store %arg8[%c0_7, %c0_8], %12 {strides = array<i32>} : memref<128x128xbf16, #tpu.memory_space<vmem>>, vector<32x128xbf16>,
    %cst = arith.constant 0.000000e+00 : bf16
    %14 = vector.broadcast %cst : bf16 to vector<96x128xbf16>
    %c32 = arith.constant 32 : index
    %c0_9 = arith.constant 0 : index
    %15 = vector.load %arg8[%c32, %c0_9] : memref<128x128xbf16, #tpu.memory_space<vmem>>, vector<96x128xbf16>
    tpu.vector_store %arg8[%c32, %c0_9], %14 {strides = array<i32>} : memref<128x128xbf16, #tpu.memory_space<vmem>>, vector<96x128xbf16>,
    %c0_10 = arith.constant 0 : index
    %c0_11 = arith.constant 0 : index
    %c0_12 = arith.constant 0 : index
    %16 = vector.load %arg3[%c0_10, %c0_11, %c0_12] : memref<4x128x128xbf16, #tpu.memory_space<vmem>>, vector<1x64x128xbf16>
    %17 = vector.shape_cast %16 : vector<1x64x128xbf16> to vector<64x128xbf16>
    %c0_13 = arith.constant 0 : index
    %c0_14 = arith.constant 0 : index
    %18 = vector.load %arg8[%c0_13, %c0_14] : memref<128x128xbf16, #tpu.memory_space<vmem>>, vector<128x128xbf16>
    %cst_15 = arith.constant dense<0.000000e+00> : vector<64x128xf32>
    %19 = tpu.matmul %17, %18, %cst_15 {dimension_numbers = #tpu.dot_dimension_numbers<[1], [0], [0], [1], [0, 0, 1, 1], [], []>} : vector<64x128xbf16>, vector<128x128xbf16>, vector<64x128xf32> -> vector<64x128xf32>
    %c0_16 = arith.constant 0 : index
    %c0_17 = arith.constant 0 : index
    %c0_18 = arith.constant 0 : index
    %20 = vector.load %arg4[%c0_16, %c0_17, %c0_18] : memref<4x128x1xf32, #tpu.memory_space<vmem>>, vector<1x64x1xf32>
    %21 = vector.shape_cast %20 : vector<1x64x1xf32> to vector<64x1xf32>
    %22 = vector.broadcast %21 : vector<64x1xf32> to vector<64x128xf32>
    %23 = arith.addf %19, %22 : vector<64x128xf32>
    %24 = math.tanh %23 : vector<64x128xf32>
    %25 = arith.truncf %24 : vector<64x128xf32> to vector<64x128xbf16>
    %c0_19 = arith.constant 0 : index
    %c0_20 = arith.constant 0 : index
    %26 = vector.load %arg8[%c0_19, %c0_20] : memref<128x128xbf16, #tpu.memory_space<vmem>>, vector<64x128xbf16>
    tpu.vector_store %arg8[%c0_19, %c0_20], %25 {strides = array<i32>} : memref<128x128xbf16, #tpu.memory_space<vmem>>, vector<64x128xbf16>,
    %c1_21 = arith.constant 1 : index
    %c0_22 = arith.constant 0 : index
    %c0_23 = arith.constant 0 : index
    %27 = vector.load %arg3[%c1_21, %c0_22, %c0_23] : memref<4x128x128xbf16, #tpu.memory_space<vmem>>, vector<1x112x128xbf16>
    %28 = vector.shape_cast %27 : vector<1x112x128xbf16> to vector<112x128xbf16>
    %c0_24 = arith.constant 0 : index
    %c0_25 = arith.constant 0 : index
    %29 = vector.load %arg8[%c0_24, %c0_25] : memref<128x128xbf16, #tpu.memory_space<vmem>>, vector<128x128xbf16>
    %cst_26 = arith.constant dense<0.000000e+00> : vector<112x128xf32>
    %30 = tpu.matmul %28, %29, %cst_26 {dimension_numbers = #tpu.dot_dimension_numbers<[1], [0], [0], [1], [0, 0, 1, 1], [], []>} : vector<112x128xbf16>, vector<128x128xbf16>, vector<112x128xf32> -> vector<112x128xf32>
    %c1_27 = arith.constant 1 : index
    %c0_28 = arith.constant 0 : index
    %c0_29 = arith.constant 0 : index
    %31 = vector.load %arg4[%c1_27, %c0_28, %c0_29] : memref<4x128x1xf32, #tpu.memory_space<vmem>>, vector<1x112x1xf32>
    %32 = vector.shape_cast %31 : vector<1x112x1xf32> to vector<112x1xf32>
    %33 = vector.broadcast %32 : vector<112x1xf32> to vector<112x128xf32>
    %34 = arith.addf %30, %33 : vector<112x128xf32>
    %35 = math.tanh %34 : vector<112x128xf32>
    %36 = arith.truncf %35 : vector<112x128xf32> to vector<112x128xbf16>
    %c0_30 = arith.constant 0 : index
    %c0_31 = arith.constant 0 : index
    %37 = vector.load %arg8[%c0_30, %c0_31] : memref<128x128xbf16, #tpu.memory_space<vmem>>, vector<112x128xbf16>
    tpu.vector_store %arg8[%c0_30, %c0_31], %36 {strides = array<i32>} : memref<128x128xbf16, #tpu.memory_space<vmem>>, vector<112x128xbf16>,
    %c2 = arith.constant 2 : index
    %c0_32 = arith.constant 0 : index
    %c0_33 = arith.constant 0 : index
    %38 = vector.load %arg3[%c2, %c0_32, %c0_33] : memref<4x128x128xbf16, #tpu.memory_space<vmem>>, vector<1x64x128xbf16>
    %39 = vector.shape_cast %38 : vector<1x64x128xbf16> to vector<64x128xbf16>
    %c0_34 = arith.constant 0 : index
    %c0_35 = arith.constant 0 : index
    %40 = vector.load %arg8[%c0_34, %c0_35] : memref<128x128xbf16, #tpu.memory_space<vmem>>, vector<128x128xbf16>
    %cst_36 = arith.constant dense<0.000000e+00> : vector<64x128xf32>
    %41 = tpu.matmul %39, %40, %cst_36 {dimension_numbers = #tpu.dot_dimension_numbers<[1], [0], [0], [1], [0, 0, 1, 1], [], []>} : vector<64x128xbf16>, vector<128x128xbf16>, vector<64x128xf32> -> vector<64x128xf32>
    %c2_37 = arith.constant 2 : index
    %c0_38 = arith.constant 0 : index
    %c0_39 = arith.constant 0 : index
    %42 = vector.load %arg4[%c2_37, %c0_38, %c0_39] : memref<4x128x1xf32, #tpu.memory_space<vmem>>, vector<1x64x1xf32>
    %43 = vector.shape_cast %42 : vector<1x64x1xf32> to vector<64x1xf32>
    %44 = vector.broadcast %43 : vector<64x1xf32> to vector<64x128xf32>
    %45 = arith.addf %41, %44 : vector<64x128xf32>
    %46 = math.tanh %45 : vector<64x128xf32>
    %47 = arith.truncf %46 : vector<64x128xf32> to vector<64x128xbf16>
    %c0_40 = arith.constant 0 : index
    %c0_41 = arith.constant 0 : index
    %48 = vector.load %arg8[%c0_40, %c0_41] : memref<128x128xbf16, #tpu.memory_space<vmem>>, vector<64x128xbf16>
    tpu.vector_store %arg8[%c0_40, %c0_41], %47 {strides = array<i32>} : memref<128x128xbf16, #tpu.memory_space<vmem>>, vector<64x128xbf16>,
    %c3 = arith.constant 3 : index
    %c0_42 = arith.constant 0 : index
    %c0_43 = arith.constant 0 : index
    %49 = vector.load %arg3[%c3, %c0_42, %c0_43] : memref<4x128x128xbf16, #tpu.memory_space<vmem>>, vector<1x32x128xbf16>
    %50 = vector.shape_cast %49 : vector<1x32x128xbf16> to vector<32x128xbf16>
    %c0_44 = arith.constant 0 : index
    %c0_45 = arith.constant 0 : index
    %51 = vector.load %arg8[%c0_44, %c0_45] : memref<128x128xbf16, #tpu.memory_space<vmem>>, vector<128x128xbf16>
    %cst_46 = arith.constant dense<0.000000e+00> : vector<32x128xf32>
    %52 = tpu.matmul %50, %51, %cst_46 {dimension_numbers = #tpu.dot_dimension_numbers<[1], [0], [0], [1], [0, 0, 1, 1], [], []>} : vector<32x128xbf16>, vector<128x128xbf16>, vector<32x128xf32> -> vector<32x128xf32>
    %c3_47 = arith.constant 3 : index
    %c0_48 = arith.constant 0 : index
    %c0_49 = arith.constant 0 : index
    %53 = vector.load %arg4[%c3_47, %c0_48, %c0_49] : memref<4x128x1xf32, #tpu.memory_space<vmem>>, vector<1x32x1xf32>
    %54 = vector.shape_cast %53 : vector<1x32x1xf32> to vector<32x1xf32>
    %55 = vector.broadcast %54 : vector<32x1xf32> to vector<32x128xf32>
    %56 = arith.addf %52, %55 : vector<32x128xf32>
    %57 = math.tanh %56 : vector<32x128xf32>
    %c0_50 = arith.constant 0 : index
    %c0_51 = arith.constant 0 : index
    %58 = vector.load %arg5[%c0_50, %c0_51] : memref<32x1xf32, #tpu.memory_space<vmem>>, vector<32x1xf32>
    %59 = vector.broadcast %58 : vector<32x1xf32> to vector<32x128xf32>
    %60 = arith.mulf %59, %57 : vector<32x128xf32>
    %cst_52 = arith.constant dense<0.000000e+00> : vector<128xf32>
    %61 = vector.multi_reduction <add>, %60, %cst_52 [0] : vector<32x128xf32> to vector<128xf32>
    %62 = vector.shape_cast %61 : vector<128xf32> to vector<1x128xf32>
    %c0_53 = arith.constant 0 : index
    %c0_54 = arith.constant 0 : index
    %63 = memref.load %arg6[%c0_53, %c0_54] : memref<1x1xf32, #tpu.memory_space<smem>>
    %64 = vector.broadcast %63 : f32 to vector<1x128xf32>
    %65 = arith.addf %62, %64 : vector<1x128xf32>
    %c0_55 = arith.constant 0 : index
    %c0_56 = arith.constant 0 : index
    %c0_57 = arith.constant 0 : index
    %66 = vector.load %arg7[%c0_55, %c0_56, %c0_57] : memref<1x1x128xf32, #tpu.memory_space<vmem>>, vector<1x1x128xf32>
    %67 = vector.shape_cast %66 : vector<1x1x128xf32> to vector<1x128xf32>
    %68 = vector.shape_cast %65 : vector<1x128xf32> to vector<1x1x128xf32>
    tpu.vector_store %arg7[%c0_55, %c0_56, %c0_57], %68 {strides = array<i32>} : memref<1x1x128xf32, #tpu.memory_space<vmem>>, vector<1x1x128xf32>,
    return
  }
  func.func @transform_0(%arg0: i32) -> (i32, i32, i32) {
    %c0_i32 = arith.constant 0 : i32
    %c0_i32_0 = arith.constant 0 : i32
    %c0_i32_1 = arith.constant 0 : i32
    return %arg0, %c0_i32, %c0_i32_0 : i32, i32, i32
  }
  func.func @transform_1(%arg0: i32) -> (i32, i32, i32) {
    %c0_i32 = arith.constant 0 : i32
    %c0_i32_0 = arith.constant 0 : i32
    %c0_i32_1 = arith.constant 0 : i32
    %c0_i32_2 = arith.constant 0 : i32
    return %c0_i32, %c0_i32_0, %c0_i32_1 : i32, i32, i32
  }
  func.func @transform_2(%arg0: i32) -> (i32, i32, i32) {
    %c0_i32 = arith.constant 0 : i32
    %c0_i32_0 = arith.constant 0 : i32
    %c0_i32_1 = arith.constant 0 : i32
    %c0_i32_2 = arith.constant 0 : i32
    return %c0_i32, %c0_i32_0, %c0_i32_1 : i32, i32, i32
  }
  func.func @transform_3(%arg0: i32) -> (i32, i32, i32) {
    %c0_i32 = arith.constant 0 : i32
    %c0_i32_0 = arith.constant 0 : i32
    %c0_i32_1 = arith.constant 0 : i32
    %c0_i32_2 = arith.constant 0 : i32
    return %c0_i32, %c0_i32_0, %c0_i32_1 : i32, i32, i32
  }
  func.func @transform_4(%arg0: i32) -> (i32, i32) {
    %c0_i32 = arith.constant 0 : i32
    %c0_i32_0 = arith.constant 0 : i32
    %c0_i32_1 = arith.constant 0 : i32
    return %c0_i32, %c0_i32_0 : i32, i32
  }
  func.func @transform_5(%arg0: i32) -> (i32, i32) {
    %c0_i32 = arith.constant 0 : i32
    %c0_i32_0 = arith.constant 0 : i32
    %c0_i32_1 = arith.constant 0 : i32
    return %c0_i32, %c0_i32_0 : i32, i32
  }
  func.func @transform_6(%arg0: i32) -> (i32, i32, i32) {
    %c0_i32 = arith.constant 0 : i32
    %c0_i32_0 = arith.constant 0 : i32
    %c0_i32_1 = arith.constant 0 : i32
    return %arg0, %c0_i32, %c0_i32_0 : i32, i32, i32
  }
}

</mosaic_0001>

<bundles_post_ra>
// kernel: net_sigmoid6_slim.1
= control target key start
LH: loop header
LB: loop body
LE: loop exit
PB: predicated region body
PF: predicated region fallthrough
CT: control target
= control target key end

     0   :  { %v1787_v0 = vmov 0   ;;  %vm1789_vm0 = vmmov 0   ;;  %s2057_s1 = inlined_call_operand.vmem [shape: f32[2,32,1], index: 1, kind: input, shape index: {}]   ;;  %s2058_s3 = inlined_call_operand.vmem [shape: f32[4,128,1], index: 3, kind: input, shape index: {}]   ;;  %s2059_s2 = inlined_call_operand.vmem [shape: bf16[4,128,128], index: 2, kind: input, shape index: {}]   ;;  %s2060_s4 = inlined_call_operand.vmem [shape: f32[32,1], index: 4, kind: input, shape index: {}]   ;;  %s2061_s0 = inlined_call_operand.vmem [shape: f32[1,1,128], index: 0, kind: input, shape index: {}]   ;;  %s2062_s5 = inlined_call_operand.<no memory space> [shape: f32[1,1], index: 5, kind: input, shape index: {}]   ;;  %s2063_s6 = inlined_call_operand.vmem [shape: f32[1,1,128], index: 6, kind: output, shape index: {}]  }
   0x1   :  { %1661 = vset.pattern.permute.xlu1 %v1787_v0  ;;  %113 = vst [vmem:[#allocation2 + $0x10] sm:$0xf] %v1787_v0  ;;  %114 = vst [vmem:[#allocation2 + $0x14] sm:$0xf] %v1787_v0  ;;  %1660 = vset.pattern.permute.xlu0 %v1787_v0  ;;  %v1227_v1 = vld [vmem:[%s2057_s1 + $0x30] sm:$0xff]  ;;  %v1228_v3 = vld [vmem:[%s2057_s1 + $0x38] sm:$0xff] }
   0x2   :  { %115 = vst [vmem:[#allocation2 + $0x18] sm:$0xf] %v1787_v0  ;;  %116 = vst [vmem:[#allocation2 + $0x1c] sm:$0xf] %v1787_v0  ;;  %v28_v2 = vld [vmem:[%s2057_s1 + $0x10] sm:$0xff]  ;;  %77 = vperm.xlu1 %1661, %v1227_v1   ;;  %v29_v4 = vld [vmem:[%s2057_s1 + $0x18] sm:$0xff] }
   0x3   :  { %117 = vst [vmem:[#allocation2 + $0x20] sm:$0xf] %v1787_v0  ;;  %118 = vst [vmem:[#allocation2 + $0x24] sm:$0xf] %v1787_v0  ;;  %42 = vperm.xlu0 %1660, %v28_v2   ;;  %v27_v5 = vld [vmem:[%s2057_s1 + $0x8] sm:$0xff]  ;;  %v26_v6 = vld [vmem:[%s2057_s1] sm:$0xff] }
   0x4   :  { %119 = vst [vmem:[#allocation2 + $0x28] sm:$0xf] %v1787_v0  ;;  %120 = vst [vmem:[#allocation2 + $0x2c] sm:$0xf] %v1787_v0  ;;  %v1226_v7 = vld [vmem:[%s2057_s1 + $0x28] sm:$0xff]  ;;  %v1225_v8 = vld [vmem:[%s2057_s1 + $0x20] sm:$0xff] }
   0x5   :  { %121 = vst [vmem:[#allocation2 + $0x30] sm:$0xf] %v1787_v0  ;;  %122 = vst [vmem:[#allocation2 + $0x34] sm:$0xf] %v1787_v0  ;;  %v156_v9 = vld [vmem:[%s2058_s3 + $0x38] sm:$0xff]  ;;  %v155_v10 = vld [vmem:[%s2058_s3 + $0x30] sm:$0xff] }
   0x6   :  { %123 = vst [vmem:[#allocation2 + $0x38] sm:$0xf] %v1787_v0  ;;  %124 = vst [vmem:[#allocation2 + $0x3c] sm:$0xf] %v1787_v0  ;;  %82 = vperm.xlu1 %1661, %v1228_v3   ;;  %v154_v11 = vld [vmem:[%s2058_s3 + $0x28] sm:$0xff]  ;;  %v153_v14 = vld [vmem:[%s2058_s3 + $0x20] sm:$0xff] }
   0x7   :  { %47 = vperm.xlu0 %1660, %v29_v4   ;;  %v152_v16 = vld [vmem:[%s2058_s3 + $0x18] sm:$0xff]  ;;  %v151_v17 = vld [vmem:[%s2058_s3 + $0x10] sm:$0xff]  ;;  %v150_v19 = vld [vmem:[%s2058_s3 + $0x8] sm:$0xff] }
   0x8   :  { %v149_v20 = vld [vmem:[%s2058_s3] sm:$0xff]  ;;  %v1280_v22 = vld [vmem:[%s2058_s3 + $0xe8] sm:$0xff]  ;;  %v1667_v24 = vld [vmem:[#allocation2 + $0x10] sm:$0xff]  }
   0x9   :  { %v1666_v21 = vld [vmem:[#allocation2 + $0x18] sm:$0xff]   ;;  %v1279_v23 = vld [vmem:[%s2058_s3 + $0xe0] sm:$0xff]  ;;  %v1277_v26 = vld [vmem:[%s2058_s3 + $0xd0] sm:$0xff] }
   0xa   :  { %37 = vperm.xlu1 %1661, %v27_v5   ;;  %v1665_v18 = vld [vmem:[#allocation2 + $0x20] sm:$0xff]   ;;  %v1278_v25 = vld [vmem:[%s2058_s3 + $0xd8] sm:$0xff]  ;;  %v1276_v27 = vld [vmem:[%s2058_s3 + $0xc8] sm:$0xff] }
   0xb   :  { %32 = vperm.xlu0 %1660, %v26_v6   ;;  %v1664_v15 = vld [vmem:[#allocation2 + $0x28] sm:$0xff]   ;;  %v1275_v28 = vld [vmem:[%s2058_s3 + $0xc0] sm:$0xff]  ;;  %v1274_v30 = vld [vmem:[%s2058_s3 + $0xb8] sm:$0xff] }
   0xc   :  { %v1663_v13 = vld [vmem:[#allocation2 + $0x30] sm:$0xff]   ;;  %v1670_v29 = vld [vmem:[%s2059_s2] sm:$0xff]   ;;  %v1272_v32 = vld [vmem:[%s2058_s3 + $0xa8] sm:$0xff] }
   0xd   :  { %v1662_v12 = vld [vmem:[#allocation2 + $0x38] sm:$0xff]   ;;  %v1273_v31 = vld [vmem:[%s2058_s3 + $0xb0] sm:$0xff]  ;;  %1561 = vmatprep.mubr.bf16.mxu0 %v1670_v29  ;;  %v1271_v33 = vld [vmem:[%s2058_s3 + $0xa0] sm:$0xff] }
   0xe   :  { %72 = vperm.xlu1 %1661, %v1226_v7   ;;  %1545 = vmatprep.subr.bf16.mxu0 %v1662_v12  ;;  %v1270_v34 = vld [vmem:[%s2058_s3 + $0x98] sm:$0xff]  ;;  %v1269_v35 = vld [vmem:[%s2058_s3 + $0x90] sm:$0xff]  ;;  %v1268_v36 = vld [vmem:[%s2058_s3 + $0x88] sm:$0xff] }
   0xf   :  { %67 = vperm.xlu0 %1660, %v1225_v8   ;;  %1546 = vmatpush3.bf16.msra.mxu0 %v1662_v12  ;;  %v1267_v37 = vld [vmem:[%s2058_s3 + $0x80] sm:$0xff]  ;;  %v1325_v38 = vld [vmem:[%s2058_s3 + $0x138] sm:$0xff]  ;;  %v1324_v39 = vld [vmem:[%s2058_s3 + $0x130] sm:$0xff] }
  0x10   :  { %1547 = vmatprep.subr.bf16.mxu0 %v1663_v13  ;;  %v1323_v40 = vld [vmem:[%s2058_s3 + $0x128] sm:$0xff]  ;;  %v1322_v41 = vld [vmem:[%s2058_s3 + $0x120] sm:$0xff]  ;;  %v1321_v42 = vld [vmem:[%s2058_s3 + $0x118] sm:$0xff] }
  0x11   :  { %v1320_v43 = vld [vmem:[%s2058_s3 + $0x110] sm:$0xff]  ;;  %v1319_v44 = vld [vmem:[%s2058_s3 + $0x108] sm:$0xff]  ;;  %v1318_v45 = vld [vmem:[%s2058_s3 + $0x100] sm:$0xff] }
  0x12   :  { %194 = vperm.xlu1 %1661, %v156_v9   ;;  %v1351_v46 = vld [vmem:[%s2058_s3 + $0x188] sm:$0xff]  ;;  %v1350_v47 = vld [vmem:[%s2058_s3 + $0x180] sm:$0xff]  ;;  %v1353_v48 = vld [vmem:[%s2058_s3 + $0x198] sm:$0xff] }
  0x13   :  { %189 = vperm.xlu0 %1660, %v155_v10   ;;  %1548 = vmatpush3.bf16.msra.mxu0 %v1663_v13  ;;  %v1352_v49 = vld [vmem:[%s2058_s3 + $0x190] sm:$0xff]  ;;  %v1180_v50 = vld [vmem:[%s2060_s4 + $0x8] sm:$0xff]  ;;  %v1179_v51 = vld [vmem:[%s2060_s4] sm:$0xff] }
  0x14   :  { %1549 = vmatprep.subr.bf16.mxu0 %v1664_v15  ;;  %v1182_v52 = vld [vmem:[%s2060_s4 + $0x18] sm:$0xff]  ;;  %v1181_v53 = vld [vmem:[%s2060_s4 + $0x10] sm:$0xff]  ;;  %v1224_v54 = vld [vmem:[%s2061_s0] ss:$0 sm:$0xff] }
  0x16   :  { %184 = vperm.xlu1 %1661, %v154_v11  }
  0x17   :  { %179 = vperm.xlu0 %1660, %v153_v14   ;;  %1550 = vmatpush3.bf16.msra.mxu0 %v1664_v15  ;;  %v1671_v15 = vld [vmem:[%s2059_s2 + $0x8] sm:$0xff]  }
  0x18   :  { %1551 = vmatprep.subr.bf16.mxu0 %v1665_v18 }
  0x1a   :  { %174 = vperm.xlu1 %1661, %v152_v16   ;;  %v1672_v16 = vld [vmem:[%s2059_s2 + $0x10] sm:$0xff]  }
  0x1b   :  { %169 = vperm.xlu0 %1660, %v151_v17   ;;  %1552 = vmatpush3.bf16.msra.mxu0 %v1665_v18  ;;  %v1673_v17 = vld [vmem:[%s2059_s2 + $0x18] sm:$0xff]  }
  0x1c   :  { %1553 = vmatprep.subr.bf16.mxu0 %v1666_v21  ;;  %v1674_v18 = vld [vmem:[#allocation2 + $0x38] sm:$0xff]  }
  0x1e   :  { %164 = vperm.xlu1 %1661, %v150_v19   ;;  %v1788_v19 = vmov 0.0  }
  0x1f   :  { %159 = vperm.xlu0 %1660, %v149_v20   ;;  %1554 = vmatpush3.bf16.msra.mxu0 %v1666_v21  ;;  %v1675_v20 = vld [vmem:[#allocation2 + $0x30] sm:$0xff]   ;;  %v1676_v21 = vld [vmem:[#allocation2 + $0x28] sm:$0xff]  }
  0x20   :  { %1555 = vmatprep.subr.bf16.mxu0 %v1667_v24  ;;  %1569 = vmatprep.subr.bf16.mxu1 %v1788_v19 }
  0x21   :  { %1570 = vmatpush3.bf16.msra.mxu1 %v1674_v18  ;;  %1585 = vmatprep.mubr.msk.bf16.mxu1 %vm1789_vm0, %v1788_v19 }
  0x22   :  { %495 = vperm.xlu1 %1661, %v1280_v22   ;;  %1571 = vmatprep.subr.bf16.mxu1 %v1788_v19  ;;  %v1677_v22 = vld [vmem:[#allocation2 + $0x20] sm:$0xff]  }
  0x23   :  { %490 = vperm.xlu0 %1660, %v1279_v23   ;;  %1556 = vmatpush3.bf16.msra.mxu0 %v1667_v24 }
  0x25   :  { %1572 = vmatpush3.bf16.msra.mxu1 %v1675_v20 }
  0x26   :  { %485 = vperm.xlu1 %1661, %v1278_v25   ;;  %1573 = vmatprep.subr.bf16.mxu1 %v1788_v19 }
  0x27   :  { %480 = vperm.xlu0 %1660, %v1277_v26  }
  0x29   :  { %1574 = vmatpush3.bf16.msra.mxu1 %v1676_v21 }
  0x2a   :  { %475 = vperm.xlu1 %1661, %v1276_v27   ;;  %1575 = vmatprep.subr.bf16.mxu1 %v1788_v19 }
  0x2b   :  { %470 = vperm.xlu0 %1660, %v1275_v28  }
  0x2d   :  { %1576 = vmatpush3.bf16.msra.mxu1 %v1677_v22 }
  0x2e   :  { %465 = vperm.xlu1 %1661, %v1274_v30   ;;  %1577 = vmatprep.subr.bf16.mxu1 %v1788_v19 }
  0x2f   :  { %460 = vperm.xlu0 %1660, %v1273_v31  }
  0x32   :  { %455 = vperm.xlu1 %1661, %v1272_v32  }
  0x33   :  { %450 = vperm.xlu0 %1660, %v1271_v33  }
  0x36   :  { %445 = vperm.xlu1 %1661, %v1270_v34  }
  0x37   :  { %440 = vperm.xlu0 %1660, %v1269_v35  }
  0x3a   :  { %435 = vperm.xlu1 %1661, %v1268_v36  }
  0x3b   :  { %430 = vperm.xlu0 %1660, %v1267_v37  }
  0x3e   :  { %832 = vperm.xlu1 %1661, %v1325_v38  }
  0x3f   :  { %827 = vperm.xlu0 %1660, %v1324_v39  }
  0x42   :  { %822 = vperm.xlu1 %1661, %v1323_v40  }
  0x43   :  { %817 = vperm.xlu0 %1660, %v1322_v41  }
  0x46   :  { %812 = vperm.xlu1 %1661, %v1321_v42  }
  0x47   :  { %807 = vperm.xlu0 %1660, %v1320_v43  }
  0x4a   :  { %802 = vperm.xlu1 %1661, %v1319_v44  }
  0x4b   :  { %797 = vperm.xlu0 %1660, %v1318_v45  }
  0x4e   :  { %1053 = vperm.xlu1 %1661, %v1351_v46  }
  0x4f   :  { %1048 = vperm.xlu0 %1660, %v1350_v47  }
  0x52   :  { %1063 = vperm.xlu1 %1661, %v1353_v48  }
  0x53   :  { %1058 = vperm.xlu0 %1660, %v1352_v49  }
  0x56   :  { %1190 = vperm.xlu1 %1661, %v1180_v50  }
  0x57   :  { %1185 = vperm.xlu0 %1660, %v1179_v51  }
  0x5a   :  { %1200 = vperm.xlu1 %1661, %v1182_v52  }
  0x5b   :  { %1195 = vperm.xlu0 %1660, %v1181_v53  }
  0x7d   :  { %v78_v55 = vpop.permute.xlu1 %77 }
  0x7e   :  { %v43_v56 = vpop.permute.xlu0 %42 }
  0x7f   :  { %v58_v57 = vmul.f32 %v1224_v54, %v43_v56 }
  0x81   :  { %v87_v58 = vadd.f32 %v78_v55, %v58_v57  ;;  %v83_v59 = vpop.permute.xlu1 %82 }
  0x82   :  { %v48_v60 = vpop.permute.xlu0 %47 }
  0x83   :  { %v59_v61 = vmul.f32 %v1224_v54, %v48_v60  ;;  %1711 = vtanh.f32 %v87_v58 }
  0x85   :  { %v88_v62 = vadd.f32 %v83_v59, %v59_v61  ;;  %v38_v63 = vpop.permute.xlu1 %37 }
  0x86   :  { %v33_v0 = vpop.permute.xlu0 %32  ;;  %v57_v1 = vmul.f32 %v1224_v54, %v38_v63  ;;  %v1682_v63 = vld [vmem:[%s2059_s2 + $0x40] sm:$0xff]  }
  0x87   :  { %1713 = vtanh.f32 %v88_v62  ;;  %v56_v2 = vmul.f32 %v1224_v54, %v33_v0  ;;  %v1683_v0 = vld [vmem:[%s2059_s2 + $0x48] sm:$0xff]  }
  0x89   :  { %v73_v3 = vpop.permute.xlu1 %72 }
  0x8a   :  { %v68_v4 = vpop.permute.xlu0 %67  ;;  %v86_v5 = vadd.f32 %v73_v3, %v57_v1  ;;  %v1684_v1 = vld [vmem:[%s2059_s2 + $0x50] sm:$0xff]   ;;  %v1686_v3 = vld [vmem:[%s2059_s2 + $0x60] sm:$0xff]  }
  0x8b   :  { %v85_v6 = vadd.f32 %v68_v4, %v56_v2  ;;  %v1685_v2 = vld [vmem:[%s2059_s2 + $0x58] sm:$0xff]   ;;  %v1687_v4 = vld [vmem:[%s2059_s2 + $0x68] sm:$0xff]  }
  0x8c   :  { %1715 = vtanh.f32 %v86_v5  ;;  %v1688_v5 = vld [vmem:[%s2059_s2 + $0x70] sm:$0xff]  }
  0x8d   :  { %1717 = vtanh.f32 %v85_v6  ;;  %v195_v24 = vpop.permute.xlu1 %194  ;;  %v1689_v6 = vld [vmem:[#allocation2 + $0x38] sm:$0xff]  }
  0x8e   :  { %v190_v23 = vpop.permute.xlu0 %189 }
  0x90   :  { %v1712_v7 = vpop.eup %1711 }
  0x91   :  { %v185_v26 = vpop.permute.xlu1 %184 }
  0x92   :  { %v180_v25 = vpop.permute.xlu0 %179 }
  0x94   :  { %v1714_v8 = vpop.eup %1713 }
  0x95   :  { %v1406_v9 = vpack.c.bf16 %v1714_v8, %v1712_v7  ;;  %v175_v28 = vpop.permute.xlu1 %174  ;;  %v1690_v7 = vld [vmem:[#allocation2 + $0x38] sm:$0xff]  }
  0x96   :  { %v170_v27 = vpop.permute.xlu0 %169 }
  0x97   :  { %1483 = vst [vmem:[#allocation2 + $0x8] sm:$0xff] %v1406_v9  }
  0x99   :  { %v1716_v10 = vpop.eup %1715  ;;  %v165_v36 = vpop.permute.xlu1 %164 }
  0x9a   :  { %v1718_v11 = vpop.eup %1717  ;;  %v160_v32 = vpop.permute.xlu0 %159 }
  0x9b   :  { %v1401_v12 = vpack.c.bf16 %v1716_v10, %v1718_v11 }
  0x9d   :  { %1402 = vst [vmem:[#allocation2] sm:$0xff] %v1401_v12   ;;  %v2023_v9 = vpop.permute.xlu1 %495 }
  0x9e   :  { %v1668_v13 = vld [vmem:[#allocation2 + $0x8] sm:$0xff]   ;;  %v2021_v8 = vpop.permute.xlu0 %490 }
  0x9f   :  { %1557 = vmatprep.subr.bf16.mxu0 %v1668_v13 }
  0xa0   :  { %1558 = vmatpush3.bf16.msra.mxu0 %v1668_v13  ;;  %v1701_v13 = vld [vmem:[%s2059_s2 + $0x80] sm:$0xff]  }
  0xa1   :  { %v2027_v11 = vpop.permute.xlu1 %485 }
  0xa2   :  { %v2025_v10 = vpop.permute.xlu0 %480 }
  0xa4   :  { %v1669_v14 = vld [vmem:[#allocation2] sm:$0xff]  }
  0xa5   :  { %1559 = vmatprep.subr.bf16.mxu0 %v1669_v14 }
  0xa6   :  { %1560 = vmatpush3.bf16.msra.mxu0 %v1669_v14  ;;  %v471_v12 = vpop.permute.xlu0 %470  ;;  %v476_v14 = vpop.permute.xlu1 %475 }
  0xa7   :  { %1613 = vmatprep.subr.bf16.mxu0 %v1689_v6 }
  0xa9   :  { %1562 = vmatmul.mubr.bf16.vlgmr.msra.gmra.mxu0 %v1671_v15 }
  0xaa   :  { %1565 = vmatprep.mubr.bf16.mxu0 %v1672_v16  ;;  %1614 = vmatpush3.bf16.msra.mxu0 %v1689_v6  ;;  %v461_v15 = vpop.permute.xlu0 %460  ;;  %v466_v16 = vpop.permute.xlu1 %465 }
  0xae   :  { %v456_v18 = vpop.permute.xlu1 %455 }
  0xb1   :  { %1566 = vmatmul.mubr.bf16.gmra.mxu0 %v1673_v17  ;;  %v451_v17 = vpop.permute.xlu0 %450 }
  0xb2   :  { %1629 = vmatprep.mubr.bf16.mxu0 %v1701_v13  ;;  %v446_v20 = vpop.permute.xlu1 %445 }
 0x169   :  { %v1563_v29 = vpop.f32.mrf.mxu0 }
 0x16a   :  { %v312_v30 = vadd.f32 %v1563_v29, %v170_v27 }
 0x16b   :  { %v303_v31 = vpop.f32.mrf.mxu0 }
 0x16c   :  { %v304_v33 = vadd.f32 %v303_v31, %v160_v32  ;;  %1719 = vtanh.f32 %v312_v30 }
 0x16d   :  { %v1564_v34 = vpop.f32.mrf.mxu0 }
 0x16e   :  { %v315_v35 = vadd.f32 %v1564_v34, %v175_v28 }
 0x16f   :  { %v306_v37 = vpop.f32.mrf.mxu0 }
 0x170   :  { %1721 = vtanh.f32 %v315_v35  ;;  %v307_v38 = vadd.f32 %v306_v37, %v165_v36 }
 0x171   :  { %1723 = vtanh.f32 %v304_v33  ;;  %v1567_v39 = vpop.f32.mrf.mxu0 }
 0x172   :  { %1725 = vtanh.f32 %v307_v38  ;;  %v328_v40 = vadd.f32 %v1567_v39, %v190_v23 }
 0x173   :  { %v319_v41 = vpop.f32.mrf.mxu0 }
 0x174   :  { %v320_v42 = vadd.f32 %v319_v41, %v180_v25  ;;  %1727 = vtanh.f32 %v328_v40  ;;  %v436_v25 = vpop.permute.xlu1 %435 }
 0x175   :  { %v1568_v43 = vpop.f32.mrf.mxu0 }
 0x176   :  { %v331_v44 = vadd.f32 %v1568_v43, %v195_v24 }
 0x177   :  { %v322_v45 = vpop.f32.mrf.mxu0 }
 0x178   :  { %1729 = vtanh.f32 %v331_v44  ;;  %v323_v46 = vadd.f32 %v322_v45, %v185_v26 }
 0x179   :  { %1731 = vtanh.f32 %v320_v42  ;;  %v1720_v47 = vpop.eup %1719 }
 0x17a   :  { %1733 = vtanh.f32 %v323_v46 }
 0x17d   :  { %v1722_v48 = vpop.eup %1721 }
 0x17e   :  { %v1724_v49 = vpop.eup %1723  ;;  %v1416_v50 = vpack.c.bf16 %v1722_v48, %v1720_v47 }
 0x17f   :  { %v1726_v51 = vpop.eup %1725 }
 0x180   :  { %1484 = vst [vmem:[#allocation2 + $0x8] sm:$0xff] %v1416_v50   ;;  %v1411_v52 = vpack.c.bf16 %v1726_v51, %v1724_v49 }
 0x181   :  { %v1728_v53 = vpop.eup %1727 }
 0x182   :  { %1412 = vst [vmem:[#allocation2] sm:$0xff] %v1411_v52  }
 0x185   :  { %v1730_v54 = vpop.eup %1729 }
 0x186   :  { %v1732_v55 = vpop.eup %1731  ;;  %v1426_v56 = vpack.c.bf16 %v1730_v54, %v1728_v53 }
 0x187   :  { %v1734_v57 = vpop.eup %1733  ;;  %v1680_v61 = vld [vmem:[#allocation2 + $0x8] sm:$0xff]  }
 0x188   :  { %1486 = vst [vmem:[#allocation2 + $0x18] sm:$0xff] %v1426_v56   ;;  %v1421_v58 = vpack.c.bf16 %v1734_v57, %v1732_v55 }
 0x189   :  { %v1681_v62 = vld [vmem:[#allocation2] sm:$0xff]  }
 0x18a   :  { %1485 = vst [vmem:[#allocation2 + $0x10] sm:$0xff] %v1421_v58  }
 0x18f   :  { %v1678_v59 = vld [vmem:[#allocation2 + $0x18] sm:$0xff]  }
 0x190   :  { %1578 = vmatpush3.bf16.msra.mxu1 %v1678_v59 }
 0x191   :  { %1579 = vmatprep.subr.bf16.mxu1 %v1788_v19  ;;  %v1679_v60 = vld [vmem:[#allocation2 + $0x10] sm:$0xff]  }
 0x194   :  { %1580 = vmatpush3.bf16.msra.mxu1 %v1679_v60 }
 0x195   :  { %1581 = vmatprep.subr.bf16.mxu1 %v1788_v19 }
 0x198   :  { %1582 = vmatpush3.bf16.msra.mxu1 %v1680_v61 }
 0x199   :  { %1583 = vmatprep.subr.bf16.mxu1 %v1788_v19 }
 0x19c   :  { %1584 = vmatpush3.bf16.msra.mxu1 %v1681_v62 }
 0x19d   :  { %1637 = vmatprep.subr.bf16.mxu1 %v1690_v7 }
 0x19f   :  { %1586 = vmatmul.mubr.bf16.vlgmr.msra.gmra.mxu1 %v1682_v63 }
 0x1a0   :  { %1589 = vmatprep.mubr.msk.bf16.mxu1 %vm1789_vm0, %v1788_v19  ;;  %1638 = vmatpush3.bf16.msra.mxu1 %v1690_v7 }
 0x1a7   :  { %1590 = vmatmul.mubr.bf16.gmra.mxu1 %v1683_v0 }
 0x1a8   :  { %1593 = vmatprep.mubr.msk.bf16.mxu1 %vm1789_vm0, %v1788_v19 }
 0x1af   :  { %1594 = vmatmul.mubr.bf16.gmra.mxu1 %v1684_v1 }
 0x1b0   :  { %1597 = vmatprep.mubr.msk.bf16.mxu1 %vm1789_vm0, %v1788_v19 }
 0x1b7   :  { %1598 = vmatmul.mubr.bf16.gmra.mxu1 %v1685_v2 }
 0x1b8   :  { %1601 = vmatprep.mubr.msk.bf16.mxu1 %vm1789_vm0, %v1788_v19 }
 0x1bf   :  { %1602 = vmatmul.mubr.bf16.gmra.mxu1 %v1686_v3 }
 0x1c0   :  { %1605 = vmatprep.mubr.msk.bf16.mxu1 %vm1789_vm0, %v1788_v19 }
 0x1c7   :  { %1606 = vmatmul.mubr.bf16.gmra.mxu1 %v1687_v4 }
 0x1c8   :  { %1609 = vmatprep.mubr.msk.bf16.mxu1 %vm1789_vm0, %v1788_v19  ;;  %v441_v19 = vpop.permute.xlu0 %440 }
 0x1cc   :  { %v431_v22 = vpop.permute.xlu0 %430 }
 0x1cf   :  { %1610 = vmatmul.mubr.bf16.gmra.mxu1 %v1688_v5 }
 0x25f   :  { %v622_v21 = vpop.f32.mrf.mxu1 }
 0x260   :  { %v623_v23 = vadd.f32 %v622_v21, %v431_v22 }
 0x261   :  { %v1587_v24 = vpop.f32.mrf.mxu1 }
 0x262   :  { %1735 = vtanh.f32 %v623_v23 }
 0x263   :  { %v625_v26 = vpop.f32.mrf.mxu1 }
 0x264   :  { %v626_v27 = vadd.f32 %v625_v26, %v436_v25 }
 0x265   :  { %v1588_v28 = vpop.f32.mrf.mxu1 }
 0x266   :  { %1737 = vtanh.f32 %v626_v27 }
 0x267   :  { %v630_v29 = vpop.f32.mrf.mxu1 }
 0x268   :  { %v631_v30 = vadd.f32 %v630_v29, %v441_v19 }
 0x269   :  { %v1591_v31 = vpop.f32.mrf.mxu1 }
 0x26a   :  { %1739 = vtanh.f32 %v631_v30 }
 0x26b   :  { %v633_v32 = vpop.f32.mrf.mxu1 }
 0x26c   :  { %v634_v33 = vadd.f32 %v633_v32, %v446_v20  ;;  %v1702_v32 = vld [vmem:[%s2059_s2 + $0x88] sm:$0xff]  }
 0x26d   :  { %v1592_v34 = vpop.f32.mrf.mxu1 }
 0x26e   :  { %1741 = vtanh.f32 %v634_v33  ;;  %v1703_v33 = vld [vmem:[%s2059_s2 + $0x90] sm:$0xff]   ;;  %v1704_v34 = vld [vmem:[%s2059_s2 + $0x98] sm:$0xff]  }
 0x26f   :  { %v638_v35 = vpop.f32.mrf.mxu1  ;;  %v1736_v38 = vpop.eup %1735 }
 0x270   :  { %v639_v36 = vadd.f32 %v638_v35, %v451_v17  ;;  %v1709_v35 = vld [vmem:[%s2059_s2 + $0xc0] sm:$0xff]  }
 0x271   :  { %v1595_v37 = vpop.f32.mrf.mxu1  ;;  %1653 = vmatprep.mubr.bf16.mxu1 %v1709_v35 }
 0x272   :  { %1743 = vtanh.f32 %v639_v36  ;;  %v828_v36 = vpop.permute.xlu0 %827  ;;  %v833_v37 = vpop.permute.xlu1 %832 }
 0x273   :  { %v1738_v39 = vpop.eup %1737  ;;  %v641_v40 = vpop.f32.mrf.mxu1 }
 0x274   :  { %v1431_v41 = vpack.c.bf16 %v1738_v39, %v1736_v38  ;;  %v642_v42 = vadd.f32 %v641_v40, %v456_v18 }
 0x275   :  { %v1596_v43 = vpop.f32.mrf.mxu1 }
 0x276   :  { %1432 = vst [vmem:[#allocation2] sm:$0xff] %v1431_v41   ;;  %1745 = vtanh.f32 %v642_v42  ;;  %v818_v38 = vpop.permute.xlu0 %817  ;;  %v823_v39 = vpop.permute.xlu1 %822 }
 0x277   :  { %v646_v44 = vpop.f32.mrf.mxu1  ;;  %v1740_v47 = vpop.eup %1739 }
 0x278   :  { %v647_v45 = vadd.f32 %v646_v44, %v461_v15 }
 0x279   :  { %v1599_v46 = vpop.f32.mrf.mxu1 }
 0x27a   :  { %1747 = vtanh.f32 %v647_v45  ;;  %v808_v40 = vpop.permute.xlu0 %807  ;;  %v813_v41 = vpop.permute.xlu1 %812 }
 0x27b   :  { %v1742_v48 = vpop.eup %1741  ;;  %v649_v49 = vpop.f32.mrf.mxu1 }
 0x27c   :  { %v1436_v50 = vpack.c.bf16 %v1742_v48, %v1740_v47  ;;  %v650_v51 = vadd.f32 %v649_v49, %v466_v16 }
 0x27d   :  { %v1600_v52 = vpop.f32.mrf.mxu1  ;;  %v1700_v31 = vld [vmem:[#allocation2] sm:$0xff]  }
 0x27e   :  { %1487 = vst [vmem:[#allocation2 + $0x8] sm:$0xff] %v1436_v50   ;;  %1749 = vtanh.f32 %v650_v51  ;;  %v798_v45 = vpop.permute.xlu0 %797  ;;  %v803_v49 = vpop.permute.xlu1 %802 }
 0x27f   :  { %v654_v53 = vpop.f32.mrf.mxu1  ;;  %v1744_v56 = vpop.eup %1743 }
 0x280   :  { %v655_v54 = vadd.f32 %v654_v53, %v471_v12 }
 0x281   :  { %v1603_v55 = vpop.f32.mrf.mxu1 }
 0x282   :  { %1751 = vtanh.f32 %v655_v54 }
 0x283   :  { %v1746_v57 = vpop.eup %1745  ;;  %v657_v58 = vpop.f32.mrf.mxu1 }
 0x284   :  { %v1441_v59 = vpack.c.bf16 %v1746_v57, %v1744_v56  ;;  %v658_v60 = vadd.f32 %v657_v58, %v476_v14 }
 0x285   :  { %v1604_v61 = vpop.f32.mrf.mxu1  ;;  %v1699_v30 = vld [vmem:[#allocation2 + $0x8] sm:$0xff]  }
 0x286   :  { %1488 = vst [vmem:[#allocation2 + $0x10] sm:$0xff] %v1441_v59   ;;  %1753 = vtanh.f32 %v658_v60 }
 0x287   :  { %v662_v62 = vpop.f32.mrf.mxu1  ;;  %v1748_v1 = vpop.eup %1747 }
 0x288   :  { %v663_v63 = vadd.f32 %v662_v62, %v2025_v10 }
 0x289   :  { %v1607_v0 = vpop.f32.mrf.mxu1 }
 0x28a   :  { %1755 = vtanh.f32 %v663_v63 }
 0x28b   :  { %v1750_v2 = vpop.eup %1749  ;;  %v665_v3 = vpop.f32.mrf.mxu1 }
 0x28c   :  { %v1446_v4 = vpack.c.bf16 %v1750_v2, %v1748_v1  ;;  %v666_v5 = vadd.f32 %v665_v3, %v2027_v11 }
 0x28d   :  { %v1608_v6 = vpop.f32.mrf.mxu1  ;;  %v1698_v29 = vld [vmem:[#allocation2 + $0x10] sm:$0xff]  }
 0x28e   :  { %1489 = vst [vmem:[#allocation2 + $0x18] sm:$0xff] %v1446_v4   ;;  %1757 = vtanh.f32 %v666_v5 }
 0x28f   :  { %v670_v7 = vpop.f32.mrf.mxu1  ;;  %v1752_v14 = vpop.eup %1751 }
 0x290   :  { %v671_v12 = vadd.f32 %v670_v7, %v2021_v8 }
 0x291   :  { %v1611_v13 = vpop.f32.mrf.mxu1 }
 0x292   :  { %1759 = vtanh.f32 %v671_v12 }
 0x293   :  { %v1754_v15 = vpop.eup %1753  ;;  %v673_v16 = vpop.f32.mrf.mxu1 }
 0x294   :  { %v1451_v17 = vpack.c.bf16 %v1754_v15, %v1752_v14  ;;  %v674_v10 = vadd.f32 %v673_v16, %v2023_v9  ;;  %v1710_v16 = vld [vmem:[%s2059_s2 + $0xc8] sm:$0xff]  }
 0x295   :  { %v1612_v18 = vpop.f32.mrf.mxu1  ;;  %v1697_v28 = vld [vmem:[#allocation2 + $0x18] sm:$0xff]  }
 0x296   :  { %1490 = vst [vmem:[#allocation2 + $0x20] sm:$0xff] %v1451_v17   ;;  %1761 = vtanh.f32 %v674_v10  ;;  %v1049_v17 = vpop.permute.xlu0 %1048  ;;  %v1054_v10 = vpop.permute.xlu1 %1053 }
 0x297   :  { %v1756_v19 = vpop.eup %1755 }
 0x29b   :  { %v1758_v11 = vpop.eup %1757 }
 0x29c   :  { %v1456_v20 = vpack.c.bf16 %v1758_v11, %v1756_v19  ;;  %v1059_v11 = vpop.permute.xlu0 %1058 }
 0x29d   :  { %v1695_v9 = vld [vmem:[#allocation2 + $0x20] sm:$0xff]  }
 0x29e   :  { %1491 = vst [vmem:[#allocation2 + $0x28] sm:$0xff] %v1456_v20   ;;  %v1696_v27 = vld [vmem:[#allocation2 + $0x20] sm:$0xff]  }
 0x29f   :  { %v1760_v21 = vpop.eup %1759 }
 0x2a3   :  { %v1762_v22 = vpop.eup %1761 }
 0x2a4   :  { %v1461_v23 = vpack.c.bf16 %v1762_v22, %v1760_v21 }
 0x2a5   :  { %v1693_v25 = vld [vmem:[#allocation2 + $0x28] sm:$0xff]  }
 0x2a6   :  { %1492 = vst [vmem:[#allocation2 + $0x30] sm:$0xff] %v1461_v23   ;;  %v1694_v26 = vld [vmem:[#allocation2 + $0x28] sm:$0xff]   ;;  %v1064_v23 = vpop.permute.xlu1 %1063 }
 0x2ad   :  { %v1691_v8 = vld [vmem:[#allocation2 + $0x30] sm:$0xff]  }
 0x2ae   :  { %v1692_v24 = vld [vmem:[#allocation2 + $0x30] sm:$0xff]   ;;  %1615 = vmatprep.subr.bf16.mxu0 %v1691_v8 }
 0x2af   :  { %1639 = vmatprep.subr.bf16.mxu1 %v1692_v24  ;;  %1616 = vmatpush3.bf16.msra.mxu0 %v1691_v8 }
 0x2b0   :  { %1640 = vmatpush3.bf16.msra.mxu1 %v1692_v24  ;;  %1617 = vmatprep.subr.bf16.mxu0 %v1693_v25 }
 0x2b1   :  { %1641 = vmatprep.subr.bf16.mxu1 %v1694_v26 }
 0x2b3   :  { %1618 = vmatpush3.bf16.msra.mxu0 %v1693_v25 }
 0x2b4   :  { %1642 = vmatpush3.bf16.msra.mxu1 %v1694_v26  ;;  %1619 = vmatprep.subr.bf16.mxu0 %v1695_v9  ;;  %v1186_v26 = vpop.permute.xlu0 %1185 }
 0x2b5   :  { %1643 = vmatprep.subr.bf16.mxu1 %v1696_v27 }
 0x2b7   :  { %1620 = vmatpush3.bf16.msra.mxu0 %v1695_v9 }
 0x2b8   :  { %1644 = vmatpush3.bf16.msra.mxu1 %v1696_v27  ;;  %1621 = vmatprep.subr.bf16.mxu0 %v1697_v28  ;;  %v1191_v27 = vpop.permute.xlu1 %1190 }
 0x2bb   :  { %1622 = vmatpush3.bf16.msra.mxu0 %v1697_v28 }
 0x2bc   :  { %1623 = vmatprep.subr.bf16.mxu0 %v1698_v29 }
 0x2bf   :  { %1624 = vmatpush3.bf16.msra.mxu0 %v1698_v29 }
 0x2c0   :  { %1625 = vmatprep.subr.bf16.mxu0 %v1699_v30 }
 0x2c3   :  { %1626 = vmatpush3.bf16.msra.mxu0 %v1699_v30 }
 0x2c4   :  { %1627 = vmatprep.subr.bf16.mxu0 %v1700_v31 }
 0x2c7   :  { %1628 = vmatpush3.bf16.msra.mxu0 %v1700_v31 }
 0x2ca   :  { %1630 = vmatmul.mubr.bf16.vlgmr.msra.gmra.mxu0 %v1702_v32 }
 0x2cb   :  { %1633 = vmatprep.mubr.bf16.mxu0 %v1703_v33  ;;  %v1196_v33 = vpop.permute.xlu0 %1195 }
 0x2d2   :  { %1634 = vmatmul.mubr.bf16.gmra.mxu0 %v1704_v34 }
 0x38a   :  { %v1631_v42 = vpop.f32.mrf.mxu0 }
 0x38b   :  { %v950_v43 = vadd.f32 %v1631_v42, %v808_v40 }
 0x38c   :  { %v941_v44 = vpop.f32.mrf.mxu0 }
 0x38d   :  { %v942_v46 = vadd.f32 %v941_v44, %v798_v45  ;;  %1763 = vtanh.f32 %v950_v43  ;;  %v1217_v45 = vstv %s2062_s5 }
 0x38e   :  { %v1632_v47 = vpop.f32.mrf.mxu0 }
 0x38f   :  { %v953_v48 = vadd.f32 %v1632_v47, %v813_v41 }
 0x390   :  { %v944_v50 = vpop.f32.mrf.mxu0 }
 0x391   :  { %1765 = vtanh.f32 %v953_v48  ;;  %v945_v51 = vadd.f32 %v944_v50, %v803_v49 }
 0x392   :  { %1767 = vtanh.f32 %v942_v46  ;;  %v1635_v52 = vpop.f32.mrf.mxu0 }
 0x393   :  { %1769 = vtanh.f32 %v945_v51  ;;  %v966_v53 = vadd.f32 %v1635_v52, %v828_v36  ;;  %v1201_v36 = vpop.permute.xlu1 %1200 }
 0x394   :  { %v957_v54 = vpop.f32.mrf.mxu0 }
 0x395   :  { %v958_v55 = vadd.f32 %v957_v54, %v818_v38  ;;  %1771 = vtanh.f32 %v966_v53 }
 0x396   :  { %v1636_v56 = vpop.f32.mrf.mxu0 }
 0x397   :  { %v969_v57 = vadd.f32 %v1636_v56, %v833_v37 }
 0x398   :  { %v960_v58 = vpop.f32.mrf.mxu0 }
 0x399   :  { %1773 = vtanh.f32 %v969_v57  ;;  %v961_v59 = vadd.f32 %v960_v58, %v823_v39 }
 0x39a   :  { %1775 = vtanh.f32 %v958_v55  ;;  %v1764_v60 = vpop.eup %1763 }
 0x39b   :  { %1777 = vtanh.f32 %v961_v59 }
 0x39e   :  { %v1766_v61 = vpop.eup %1765 }
 0x39f   :  { %v1768_v62 = vpop.eup %1767  ;;  %v1471_v63 = vpack.c.bf16 %v1766_v61, %v1764_v60 }
 0x3a0   :  { %v1770_v0 = vpop.eup %1769 }
 0x3a1   :  { %1493 = vst [vmem:[#allocation2 + $0x8] sm:$0xff] %v1471_v63   ;;  %v1466_v1 = vpack.c.bf16 %v1770_v0, %v1768_v62 }
 0x3a2   :  { %v1772_v2 = vpop.eup %1771 }
 0x3a3   :  { %1467 = vst [vmem:[#allocation2] sm:$0xff] %v1466_v1  }
 0x3a6   :  { %v1774_v3 = vpop.eup %1773 }
 0x3a7   :  { %v1776_v4 = vpop.eup %1775  ;;  %v1481_v5 = vpack.c.bf16 %v1774_v3, %v1772_v2 }
 0x3a8   :  { %v1778_v6 = vpop.eup %1777  ;;  %v1707_v14 = vld [vmem:[#allocation2 + $0x8] sm:$0xff]  }
 0x3a9   :  { %1495 = vst [vmem:[#allocation2 + $0x18] sm:$0xff] %v1481_v5   ;;  %v1476_v7 = vpack.c.bf16 %v1778_v6, %v1776_v4 }
 0x3aa   :  { %v1708_v15 = vld [vmem:[#allocation2] sm:$0xff]  }
 0x3ab   :  { %1494 = vst [vmem:[#allocation2 + $0x10] sm:$0xff] %v1476_v7  }
 0x3b0   :  { %v1705_v12 = vld [vmem:[#allocation2 + $0x18] sm:$0xff]  }
 0x3b1   :  { %1645 = vmatprep.subr.bf16.mxu1 %v1705_v12 }
 0x3b2   :  { %v1706_v13 = vld [vmem:[#allocation2 + $0x10] sm:$0xff]   ;;  %1646 = vmatpush3.bf16.msra.mxu1 %v1705_v12 }
 0x3b3   :  { %1647 = vmatprep.subr.bf16.mxu1 %v1706_v13 }
 0x3b6   :  { %1648 = vmatpush3.bf16.msra.mxu1 %v1706_v13 }
 0x3b7   :  { %1649 = vmatprep.subr.bf16.mxu1 %v1707_v14 }
 0x3ba   :  { %1650 = vmatpush3.bf16.msra.mxu1 %v1707_v14 }
 0x3bb   :  { %1651 = vmatprep.subr.bf16.mxu1 %v1708_v15 }
 0x3be   :  { %1652 = vmatpush3.bf16.msra.mxu1 %v1708_v15 }
 0x3c1   :  { %1654 = vmatmul.mubr.bf16.vlgmr.msra.gmra.mxu1 %v1710_v16 }
 0x481   :  { %v1655_v18 = vpop.f32.mrf.mxu1 }
 0x482   :  { %v1169_v21 = vadd.f32 %v1655_v18, %v1059_v11 }
 0x483   :  { %v1160_v19 = vpop.f32.mrf.mxu1 }
 0x484   :  { %v1161_v20 = vadd.f32 %v1160_v19, %v1049_v17 }
 0x485   :  { %v1656_v22 = vpop.f32.mrf.mxu1 }
 0x486   :  { %1779 = vtanh.f32 %v1161_v20  ;;  %v1172_v24 = vadd.f32 %v1656_v22, %v1064_v23 }
 0x487   :  { %v1163_v8 = vpop.f32.mrf.mxu1  ;;  %1781 = vtanh.f32 %v1169_v21 }
 0x488   :  { %v1164_v25 = vadd.f32 %v1163_v8, %v1054_v10 }
 0x48a   :  { %1783 = vtanh.f32 %v1164_v25 }
 0x48b   :  { %1785 = vtanh.f32 %v1172_v24 }
 0x493   :  { %v1780_v9 = vpop.eup %1779 }
 0x494   :  { %v1782_v28 = vpop.eup %1781  ;;  %v1203_v30 = vmul.f32 %v1780_v9, %v1186_v26 }
 0x495   :  { %v1205_v34 = vmul.f32 %v1782_v28, %v1196_v33 }
 0x497   :  { %v1784_v29 = vpop.eup %1783 }
 0x498   :  { %v1204_v31 = vmul.f32 %v1784_v29, %v1191_v27  ;;  %v1786_v32 = vpop.eup %1785 }
 0x499   :  { %v1206_v37 = vmul.f32 %v1786_v32, %v1201_v36 }
 0x49a   :  { %v1207_v35 = vadd.f32 %v1204_v31, %v1203_v30 }
 0x49c   :  { %v1208_v38 = vadd.f32 %v1207_v35, %v1205_v34 }
 0x49e   :  { %v1209_v39 = vadd.f32 %v1208_v38, %v1206_v37 }
 0x4a0   :  { %v1210_v40 = vrot.slane %v1209_v39, 4 }
 0x4a2   :  { %v1211_v41 = vadd.f32 %v1210_v40, %v1209_v39 }
 0x4a4   :  { %v1212_v42 = vrot.slane %v1211_v41, 2 }
 0x4a6   :  { %v1213_v43 = vadd.f32 %v1212_v42, %v1211_v41 }
 0x4a8   :  { %v1214_v44 = vrot.slane %v1213_v43, 1 }
 0x4aa   :  { %v1215_v46 = vadd.f32 %v1214_v44, %v1213_v43 }
 0x4ac   :  { %v1218_v47 = vadd.f32 %v1217_v45, %v1215_v46 }
 0x4ae   :  { %1219 = vst [vmem:[%s2063_s6] sm:$0x1] %v1218_v47 }

</bundles_post_ra>
